<compile_context>
chip_gen: v7x
topology: tpu7x:2x2x1
jax: 0.10.0
libtpu: 0.0.40
codegen_flags: <defaults>
</compile_context>

<pallas_src>
import functools

import jax
import jax.numpy as jnp
from jax.experimental import pallas as pl
from jax.experimental.pallas import tpu as pltpu


def _md_triplet_kernel(a_ref, p_ref, n_ref, o_ref, *, margin, batch, block_rows):
    i = pl.program_id(0)

    # Zero the resident scalar accumulator on the first grid step only.
    @pl.when(i == 0)
    def _init():
        o_ref[...] = jnp.zeros_like(o_ref)

    a = a_ref[...].astype(jnp.float32)
    p = p_ref[...].astype(jnp.float32)
    n = n_ref[...].astype(jnp.float32)

    # Per-row squared euclidean distances (reduce over the lane/embedding dim).
    # Compute each diff, square and reduce immediately to keep vreg pressure low.
    d_ap = jnp.sum((a - p) ** 2, axis=1, keepdims=True)  # (TB, 1)
    d_an = jnp.sum((a - n) ** 2, axis=1, keepdims=True)  # (TB, 1)
    d_pn = jnp.sum((p - n) ** 2, axis=1, keepdims=True)  # (TB, 1)

    losses = jnp.maximum(d_ap - jnp.maximum(d_an, d_pn) + margin, 0.0)  # relu

    # Mask rows past the true batch size on a partial last block (padded rows
    # are NOT guaranteed zero, and could even be inf/NaN garbage).
    row = i * block_rows + jax.lax.broadcasted_iota(jnp.int32, losses.shape, 0)
    losses = jnp.where(row < batch, losses, 0.0)

    o_ref[...] += jnp.sum(losses)


def md_triplet_loss(
    anchor,
    positive,
    negative,
    margin,
    size_average=True,
    *,
    max_block_rows=2048,
    vmem_tile_budget_bytes=16 * 1024 * 1024,
):
    """Pallas implementation of MDTripletLoss.forward. Returns a scalar."""
    assert anchor.shape == positive.shape == negative.shape
    assert anchor.ndim == 2
    b, d = anchor.shape
    itemsize = jnp.dtype(anchor.dtype).itemsize

    # Largest row tile such that 3 inputs x 2 pipeline buffers x (TB, D) stays
    # inside the (generation-safe) VMEM budget; multiple of 8 sublanes.
    per_row_bytes = 3 * 2 * d * itemsize
    tb = max(vmem_tile_budget_bytes // per_row_bytes, 8)
    tb = min(tb, max_block_rows)
    tb = (tb // 8) * 8
    if tb >= b:
        tb = b  # single block == full dims -> always layout-legal (any B, any D)
    grid = (pl.cdiv(b, tb),)

    kernel = functools.partial(
        _md_triplet_kernel,
        margin=float(margin),
        batch=b,
        block_rows=tb,
    )

    in_spec = pl.BlockSpec((tb, d), lambda i: (i, 0))
    # Resident scalar accumulator: same (0, 0) block for every grid step.
    out_spec = pl.BlockSpec((1, 1), lambda i: (0, 0))

    cost = pl.CostEstimate(
        flops=9 * b * d,
        transcendentals=0,
        bytes_accessed=3 * b * d * itemsize + 4,
    )

    out = pl.pallas_call(
        kernel,
        out_shape=jax.ShapeDtypeStruct((1, 1), jnp.float32),
        grid=grid,
        in_specs=[in_spec, in_spec, in_spec],
        out_specs=out_spec,
        compiler_params=pltpu.CompilerParams(
            dimension_semantics=("arbitrary",),  # sequential reduction axis
            vmem_limit_bytes=32 * 1024 * 1024,   # covers v5e's 16 MiB default
        ),
        cost_estimate=cost,
    )(anchor, positive, negative)

    total = out[0, 0]
    if size_average:
        total = total / jnp.float32(b)
    return total


def _reference(anchor, positive, negative, margin, size_average=True):
    a = anchor.astype(jnp.float32)
    p = positive.astype(jnp.float32)
    n = negative.astype(jnp.float32)
    d_ap = jnp.sum((a - p) ** 2, axis=1)
    d_an = jnp.sum((a - n) ** 2, axis=1)
    d_pn = jnp.sum((p - n) ** 2, axis=1)
    losses = jnp.maximum(d_ap - jnp.maximum(d_an, d_pn) + margin, 0.0)
    return jnp.mean(losses) if size_average else jnp.sum(losses)


if __name__ == "__main__":
    key = jax.random.PRNGKey(0)
    k_a, k_p, k_n = jax.random.split(key, 3)

    margin = 1.0

    # Case 1: small shape consistent with the module (B=8 triplets, D=32 dims),
    # single block path.
    B, D = 8, 32
    anchor = jax.random.normal(k_a, (B, D), dtype=jnp.float32)
    positive = jax.random.normal(k_p, (B, D), dtype=jnp.float32)
    negative = jax.random.normal(k_n, (B, D), dtype=jnp.float32)

    loss_mean = md_triplet_loss(anchor, positive, negative, margin, size_average=True)
    loss_sum = md_triplet_loss(anchor, positive, negative, margin, size_average=False)
    jax.block_until_ready((loss_mean, loss_sum))

    ref_mean = _reference(anchor, positive, negative, margin, size_average=True)
    ref_sum = _reference(anchor, positive, negative, margin, size_average=False)
    assert jnp.allclose(loss_mean, ref_mean, atol=1e-5, rtol=1e-5), (loss_mean, ref_mean)
    assert jnp.allclose(loss_sum, ref_sum, atol=1e-5, rtol=1e-5), (loss_sum, ref_sum)

    # Case 2: exercise the tiled/accumulating path with a partial last block
    # (B not a multiple of the row tile) by forcing a tiny tile.
    B2, D2 = 20, 32
    k_a2, k_p2, k_n2 = jax.random.split(jax.random.PRNGKey(1), 3)
    a2 = jax.random.normal(k_a2, (B2, D2), dtype=jnp.float32)
    p2 = jax.random.normal(k_p2, (B2, D2), dtype=jnp.float32)
    n2 = jax.random.normal(k_n2, (B2, D2), dtype=jnp.float32)

    loss2 = md_triplet_loss(a2, p2, n2, margin, size_average=True, max_block_rows=8)
    jax.block_until_ready(loss2)
    ref2 = _reference(a2, p2, n2, margin, size_average=True)
    assert jnp.allclose(loss2, ref2, atol=1e-5, rtol=1e-5), (loss2, ref2)

    print("KERNEL_OK")
</pallas_src>

<mosaic_0001>
module attributes {stable_mosaic.version = 11 : i64} {
  func.func @_md_triplet_kernel(%arg0: i32, %arg1: memref<8x32xf32, #tpu.memory_space<vmem>>, %arg2: memref<8x32xf32, #tpu.memory_space<vmem>>, %arg3: memref<8x32xf32, #tpu.memory_space<vmem>>, %arg4: memref<1x1xf32, #tpu.memory_space<vmem>>) attributes {dimension_semantics = [#tpu.dimension_semantics<arbitrary>], iteration_bounds = array<i64: 1>, scalar_prefetch = 0 : i64, scratch_operands = 0 : i64, tpu.core_type = #tpu.core_type<tc>, window_params = [{transform_indices = @transform_0, window_bounds = array<i64: 8, 32>}, {transform_indices = @transform_1, window_bounds = array<i64: 8, 32>}, {transform_indices = @transform_2, window_bounds = array<i64: 8, 32>}, {pipeline_mode = #tpu.pipeline_mode<synchronous>, transform_indices = @transform_3, window_bounds = array<i64: 1, 1>}]} {
    %c0_i32 = arith.constant 0 : i32
    %0 = arith.cmpi eq, %arg0, %c0_i32 : i32
    %1 = arith.extui %0 : i1 to i32
    %c0_i32_0 = arith.constant 0 : i32
    %2 = arith.cmpi ne, %1, %c0_i32_0 : i32
    scf.if %2 {
      %cst_17 = arith.constant 0.000000e+00 : f32
      %40 = vector.broadcast %cst_17 : f32 to vector<1x1xf32>
      %c0_18 = arith.constant 0 : index
      %c0_19 = arith.constant 0 : index
      %41 = vector.load %arg4[%c0_18, %c0_19] : memref<1x1xf32, #tpu.memory_space<vmem>>, vector<1x1xf32>
      tpu.vector_store %arg4[%c0_18, %c0_19], %40 {strides = array<i32>} : memref<1x1xf32, #tpu.memory_space<vmem>>, vector<1x1xf32>,
    } else {
    }
    %c0 = arith.constant 0 : index
    %c0_1 = arith.constant 0 : index
    %3 = vector.load %arg1[%c0, %c0_1] : memref<8x32xf32, #tpu.memory_space<vmem>>, vector<8x32xf32>
    %c0_2 = arith.constant 0 : index
    %c0_3 = arith.constant 0 : index
    %4 = vector.load %arg2[%c0_2, %c0_3] : memref<8x32xf32, #tpu.memory_space<vmem>>, vector<8x32xf32>
    %c0_4 = arith.constant 0 : index
    %c0_5 = arith.constant 0 : index
    %5 = vector.load %arg3[%c0_4, %c0_5] : memref<8x32xf32, #tpu.memory_space<vmem>>, vector<8x32xf32>
    %6 = arith.subf %3, %4 : vector<8x32xf32>
    %7 = arith.mulf %6, %6 : vector<8x32xf32>
    %cst = arith.constant dense<0.000000e+00> : vector<8xf32>
    %8 = vector.multi_reduction <add>, %7, %cst [1] : vector<8x32xf32> to vector<8xf32>
    %9 = vector.shape_cast %8 : vector<8xf32> to vector<8x1xf32>
    %10 = arith.subf %3, %5 : vector<8x32xf32>
    %11 = arith.mulf %10, %10 : vector<8x32xf32>
    %cst_6 = arith.constant dense<0.000000e+00> : vector<8xf32>
    %12 = vector.multi_reduction <add>, %11, %cst_6 [1] : vector<8x32xf32> to vector<8xf32>
    %13 = vector.shape_cast %12 : vector<8xf32> to vector<8x1xf32>
    %14 = arith.subf %4, %5 : vector<8x32xf32>
    %15 = arith.mulf %14, %14 : vector<8x32xf32>
    %cst_7 = arith.constant dense<0.000000e+00> : vector<8xf32>
    %16 = vector.multi_reduction <add>, %15, %cst_7 [1] : vector<8x32xf32> to vector<8xf32>
    %17 = vector.shape_cast %16 : vector<8xf32> to vector<8x1xf32>
    %18 = arith.maximumf %13, %17 : vector<8x1xf32>
    %19 = arith.subf %9, %18 : vector<8x1xf32>
    %cst_8 = arith.constant 1.000000e+00 : f32
    %20 = vector.broadcast %cst_8 : f32 to vector<8x1xf32>
    %21 = arith.addf %19, %20 : vector<8x1xf32>
    %cst_9 = arith.constant 0.000000e+00 : f32
    %22 = vector.broadcast %cst_9 : f32 to vector<8x1xf32>
    %23 = arith.maximumf %21, %22 : vector<8x1xf32>
    %c8_i32 = arith.constant 8 : i32
    %24 = arith.muli %arg0, %c8_i32 : i32
    %25 = tpu.iota {dimensions = array<i32: 0>} : vector<8x1xi32>
    %26 = vector.broadcast %24 : i32 to vector<8x1xi32>
    %27 = arith.addi %26, %25 : vector<8x1xi32>
    %c8_i32_10 = arith.constant 8 : i32
    %28 = vector.broadcast %c8_i32_10 : i32 to vector<8x1xi32>
    %29 = arith.cmpi slt, %27, %28 : vector<8x1xi32>
    %cst_11 = arith.constant 0.000000e+00 : f32
    %30 = vector.broadcast %cst_11 : f32 to vector<8x1xf32>
    %31 = arith.select %29, %23, %30 : vector<8x1xi1>, vector<8x1xf32>
    %c0_12 = arith.constant 0 : index
    %c0_13 = arith.constant 0 : index
    %32 = vector.load %arg4[%c0_12, %c0_13] : memref<1x1xf32, #tpu.memory_space<vmem>>, vector<1x1xf32>
    %33 = vector.shape_cast %31 : vector<8x1xf32> to vector<1x8x1xf32>
    %cst_14 = arith.constant dense<0.000000e+00> : vector<1xf32>
    %34 = vector.multi_reduction <add>, %33, %cst_14 [1, 2] : vector<1x8x1xf32> to vector<1xf32>
    %35 = vector.shape_cast %34 : vector<1xf32> to vector<1x1x1xf32>
    %36 = vector.extract %35[0, 0, 0] : f32 from vector<1x1x1xf32>
    %37 = vector.broadcast %36 : f32 to vector<1x1xf32>
    %38 = arith.addf %32, %37 : vector<1x1xf32>
    %c0_15 = arith.constant 0 : index
    %c0_16 = arith.constant 0 : index
    %39 = vector.load %arg4[%c0_15, %c0_16] : memref<1x1xf32, #tpu.memory_space<vmem>>, vector<1x1xf32>
    tpu.vector_store %arg4[%c0_15, %c0_16], %38 {strides = array<i32>} : memref<1x1xf32, #tpu.memory_space<vmem>>, vector<1x1xf32>,
    return
  }
  func.func @transform_0(%arg0: i32) -> (i32, i32) {
    %c0_i32 = arith.constant 0 : i32
    %c0_i32_0 = arith.constant 0 : i32
    return %arg0, %c0_i32 : i32, i32
  }
  func.func @transform_1(%arg0: i32) -> (i32, i32) {
    %c0_i32 = arith.constant 0 : i32
    %c0_i32_0 = arith.constant 0 : i32
    return %arg0, %c0_i32 : i32, i32
  }
  func.func @transform_2(%arg0: i32) -> (i32, i32) {
    %c0_i32 = arith.constant 0 : i32
    %c0_i32_0 = arith.constant 0 : i32
    return %arg0, %c0_i32 : i32, i32
  }
  func.func @transform_3(%arg0: i32) -> (i32, i32) {
    %c0_i32 = arith.constant 0 : i32
    %c0_i32_0 = arith.constant 0 : i32
    %c0_i32_1 = arith.constant 0 : i32
    return %c0_i32, %c0_i32_0 : i32, i32
  }
}

</mosaic_0001>

<bundles_post_ra>
// kernel: tpu_custom_call.1
= control target key start
LH: loop header
LB: loop body
LE: loop exit
PB: predicated region body
PF: predicated region fallthrough
CT: control target
= control target key end

     0   :  { %8 = vsyncpa [#allocation3], 0  ;;  %s294_s0 = inlined_call_operand.hbm [shape: f32[8,32], index: 0, kind: input, shape index: {}]   ;;  %s295_s1 = inlined_call_operand.hbm [shape: f32[8,32], index: 1, kind: input, shape index: {}]   ;;  %s296_s2 = inlined_call_operand.hbm [shape: f32[8,32], index: 2, kind: input, shape index: {}]   ;;  %s297_s3 = inlined_call_operand.hbm [shape: f32[1,1], index: 3, kind: output, shape index: {}]  }
   0x1   :  { %9 = vsyncpa [#allocation6], 0 }
   0x2   :  { %10 = vsyncpa [#allocation4], 0  ;;  %s219_s12 = smov [#allocation5]   ;;  %s220_s14 = smov [#allocation2]  }
   0x3   :  { %s27_s13 = sshll.u32 %s219_s12, 4  ;;  %s17_s15 = sshll.u32 %s220_s14, 4  ;;  %s28_s13 = int_to_ptr.vmem [resolvable:$true] %s27_s13  ;;  %s18_s15 = int_to_ptr.vmem [resolvable:$true] %s17_s15 }
   0x4   :  { %s125_s18 = scalar_lea.hbm %s295_s1, 128 }
   0x5   :  { %p126_p0 = scmp.ne.s32.totalorder %s295_s1, %s125_s18  ;;  %p129_p1 = scmp.lt.u32.totalorder %s125_s18, %s295_s1 }
   0x7   :  { %p131_p2 = pnand %p129_p1, %p126_p0 }
   0x9   :  { %134 = shalt.err (!%p131_p2)
}
   0xa   :  { %s135_s23 = scalar_lea.vmem %s28_s13, 128  ;;  %p140_p4 = scmp.lt.s32.totalorder %s28_s13, %s28_s13 }
   0xb   :  { %p136_p3 = scmp.ne.s32.totalorder %s28_s13, %s135_s23  ;;  %p141_p5 = scmp.lt.s32.totalorder %s135_s23, %s135_s23 }
   0xd   :  { %p142_p6 = por %p141_p5, %p140_p4 }
   0xf   :  { %p143_p7 = pnand %p142_p6, %p136_p3 }
  0x11   :  { %146 = shalt.err (!%p143_p7)
}
  0x12   :  { %30 = dma.hbm_to_vmem [thread:$0]  %s295_s1, 128, %s28_s13, [#allocation6]  }
  0x13   :  { %s147_s28 = scalar_lea.hbm %s294_s0, 128 }
  0x14   :  { %p148_p8 = scmp.ne.s32.totalorder %s294_s0, %s147_s28  ;;  %p151_p9 = scmp.lt.u32.totalorder %s147_s28, %s294_s0 }
  0x16   :  { %p153_p10 = pnand %p151_p9, %p148_p8 }
  0x18   :  { %156 = shalt.err (!%p153_p10)
}
  0x19   :  { %s157_s6 = scalar_lea.vmem %s18_s15, 128  ;;  %p162_p12 = scmp.lt.s32.totalorder %s18_s15, %s18_s15 }
  0x1a   :  { %p158_p11 = scmp.ne.s32.totalorder %s18_s15, %s157_s6  ;;  %p163_p13 = scmp.lt.s32.totalorder %s157_s6, %s157_s6 }
  0x1c   :  { %p164_p0 = por %p163_p13, %p162_p12 }
  0x1e   :  { %p165_p1 = pnand %p164_p0, %p158_p11 }
  0x20   :  { %168 = shalt.err (!%p165_p1)
}
  0x21   :  { %20 = dma.hbm_to_vmem [thread:$0]  %s294_s0, 128, %s18_s15, [#allocation3]  }
  0x22   :  { %s221_s8 = smov [#allocation7]   ;;  %s169_s12 = scalar_lea.hbm %s296_s2, 128 }
  0x23   :  { %s37_s9 = sshll.u32 %s221_s8, 4  ;;  %p170_p2 = scmp.ne.s32.totalorder %s296_s2, %s169_s12  ;;  %s38_s9 = int_to_ptr.vmem [resolvable:$true] %s37_s9 }
  0x24   :  { %p173_p3 = scmp.lt.u32.totalorder %s169_s12, %s296_s2 }
  0x26   :  { %p175_p4 = pnand %p173_p3, %p170_p2 }
  0x28   :  { %178 = shalt.err (!%p175_p4)
}
  0x29   :  { %s179_s18 = scalar_lea.vmem %s38_s9, 128  ;;  %p184_p6 = scmp.lt.s32.totalorder %s38_s9, %s38_s9 }
  0x2a   :  { %p180_p5 = scmp.ne.s32.totalorder %s38_s9, %s179_s18  ;;  %p185_p7 = scmp.lt.s32.totalorder %s179_s18, %s179_s18 }
  0x2c   :  { %p186_p8 = por %p185_p7, %p184_p6 }
  0x2e   :  { %p187_p9 = pnand %p186_p8, %p180_p5 }
  0x30   :  { %190 = shalt.err (!%p187_p9)
}
  0x31   :  { %40 = dma.hbm_to_vmem [thread:$0]  %s296_s2, 128, %s38_s9, [#allocation6]  }
  0x32   :  { %213 = dma.done.wait [#allocation3], 128  }
  0x33   :  { %214 = vsyncadd [#allocation3], 4294967168 }
  0x34   :  { %215 = dma.done.wait [#allocation6], 256  }
  0x35   :  { %216 = vsyncadd [#allocation6], 4294967040  ;;  %vm54_vm0 = vcmask 0   ;;  %v222_v0 = vmov 0.0   ;;  %v56_v1 = vld [vmem:[#allocation2] sm:$0xff]  ;;  %v58_v2 = vld [vmem:[#allocation7] sm:$0xff] }
  0x36   :  { %55 = vst.msk [vmem:[#allocation8] sm:$0x1] %vm54_vm0, %v222_v0  ;;  %v57_v3 = vld [vmem:[#allocation5] sm:$0xff]  ;;  %v65_v4 = vsub.f32 %v56_v1, %v58_v2  ;;  %vm61_vm1 = vcmask 261120   ;;  %vm87_vm2 = vcmask 7168   ;;  %s223_s2 = smov [#allocation8]  }
  0x37   :  { %v70_v5 = vsub.f32 %v57_v3, %v58_v2  ;;  %v59_v6 = vsub.f32 %v56_v1, %v57_v3  ;;  %s108_s19 = sshll.u32 %s223_s2, 4  ;;  %s109_s19 = int_to_ptr.vmem [resolvable:$true] %s108_s19 }
  0x38   :  { %v66_v7 = vmul.f32 %v65_v4, %v65_v4  ;;  %s191_s21 = scalar_lea.vmem %s109_s19, 16  ;;  %s195_s22 = scalar_lea.vmem %s109_s19, 32 }
  0x39   :  { %v71_v8 = vmul.f32 %v70_v5, %v70_v5  ;;  %v60_v9 = vmul.f32 %v59_v6, %v59_v6  ;;  %p192_p10 = scmp.ne.s32.totalorder %s109_s19, %s191_s21  ;;  %p196_p11 = scmp.lt.s32.totalorder %s109_s19, %s109_s19 }
  0x3a   :  { %v67_v10 = vsel %vm61_vm1, %v66_v7, 0.0  ;;  %p197_p12 = scmp.lt.s32.totalorder %s195_s22, %s191_s21 }
  0x3b   :  { %v62_v11 = vsel %vm61_vm1, %v60_v9, 0.0  ;;  %68 = vadd.xlane.f32.xlu0 %v67_v10  ;;  %v72_v12 = vsel %vm61_vm1, %v71_v8, 0.0 }
  0x3c   :  { %63 = vadd.xlane.f32.xlu1 %v62_v11  ;;  %p198_p13 = por %p197_p12, %p196_p11 }
  0x3d   :  { %v86_v28 = vld [vmem:[#allocation8] sm:$0x1] }
  0x3e   :  { %p199_p0 = pnand %p198_p13, %p192_p10 }
  0x3f   :  { %73 = vadd.xlane.f32.xlu0 %v72_v12 }
  0xc8   :  { %v69_v13 = vpop.xlane.xlu0 %68 }
  0xc9   :  { %v64_v15 = vpop.xlane.xlu1 %63 }
  0xcc   :  { %v74_v14 = vpop.xlane.xlu0 %73 }
  0xcd   :  { %v75_v16 = vmax.f32 %v69_v13, %v74_v14 }
  0xcf   :  { %v76_v17 = vsub.f32 %v64_v15, %v75_v16 }
  0xd1   :  { %v77_v18 = vadd.f32 1.0, %v76_v17 }
  0xd3   :  { %v78_v19 = vmax.f32 %v77_v18, 0.0 }
  0xd5   :  { %v88_v20 = vsel %vm87_vm2, %v78_v19, 0.0 }
  0xd6   :  { %89 = vadd.xlane.f32.xlu1 %v88_v20 }
 0x163   :  { %v90_v21 = vpop.xlane.xlu1 %89 }
 0x164   :  { %v91_v22 = vrot.slane %v90_v21, 4 }
 0x166   :  { %v92_v23 = vadd.f32 %v91_v22, %v90_v21 }
 0x168   :  { %v93_v24 = vrot.slane %v92_v23, 2 }
 0x16a   :  { %v94_v25 = vadd.f32 %v93_v24, %v92_v23 }
 0x16c   :  { %v95_v26 = vrot.slane %v94_v25, 1 }
 0x16e   :  { %v96_v27 = vadd.f32 %v95_v26, %v94_v25 }
 0x170   :  { %118 = vpush %v96_v27 }
 0x1a1   :  { %s119_s20 = spop %118 }
 0x1a2   :  { %v98_v29 = vstv %s119_s20 }
 0x1a3   :  { %v99_v30 = vadd.f32 %v98_v29, %v86_v28 }
 0x1a5   :  { %101 = vst.msk [vmem:[#allocation8] sm:$0x1] %vm54_vm0, %v99_v30 }
 0x1a6   :  { %202 = shalt.err (!%p199_p0)
}
 0x1a7   :  { %s203_s25 = scalar_lea.hbm %s297_s3, 16 }
 0x1a8   :  { %p204_p1 = scmp.ne.s32.totalorder %s297_s3, %s203_s25  ;;  %p207_p2 = scmp.lt.u32.totalorder %s203_s25, %s297_s3 }
 0x1aa   :  { %p209_p3 = pnand %p207_p2, %p204_p1 }
 0x1ac   :  { %212 = shalt.err (!%p209_p3)
}
 0x1ad   :  { %111 = dma.vmem_to_hbm [thread:$0]  %s109_s19, 16, %s297_s3, [#allocation4]  }
 0x1ae   :  { %217 = dma.done.wait [#allocation4], 16  }
 0x1af   :  { %218 = vsyncadd [#allocation4], 4294967280 }
 0x1b0   :  { %115 = vsyncpa [#allocation3], 1 }
 0x1b1   :  { %116 = vsyncpa [#allocation6], 1 }
 0x1b2   :  { %117 = vsyncpa [#allocation4], 1 }

</bundles_post_ra>
